<compile_context>
chip_gen: v7x
topology: tpu7x:2x2x1
jax: 0.10.0
libtpu: 0.0.40
codegen_flags: <defaults>
</compile_context>

<pallas_src>
import math

import jax
import jax.numpy as jnp
from jax.experimental import pallas as pl
from jax.experimental.pallas import tpu as pltpu

INNER_SIZE = 256


def _qkv_projection_kernel(x_ref, wqkv_ref, bq_ref, q_ref, k_ref, v_ref):
    # x_ref   : (TS, D)          bf16 input tile (batch dim squeezed)
    # wqkv_ref: (D, 3*INNER)     bf16 fused [Wq*scale | Wk | Wv]
    # bq_ref  : (1, INNER)       f32  bq * scale (bk dropped, bv deferred)
    # outputs : q/k/v (TS, INNER) bf16
    qkv = jnp.dot(x_ref[...], wqkv_ref[...],
                  preferred_element_type=jnp.float32)        # (TS, 3*INNER)
    q_ref[...] = (qkv[:, :INNER_SIZE] + bq_ref[...]).astype(q_ref.dtype)
    k_ref[...] = qkv[:, INNER_SIZE:2 * INNER_SIZE].astype(k_ref.dtype)
    v_ref[...] = qkv[:, 2 * INNER_SIZE:].astype(v_ref.dtype)


def _flash_attention_kernel(q_ref, k_ref, v_ref, bv_ref, o_ref,
                            m_sc, l_sc, acc_sc):
    # q_ref : (TQ, INNER) bf16 (scale already folded into Wq/bq)
    # k_ref : (TK, INNER) bf16
    # v_ref : (TK, INNER) bf16 (bias-free; bv added at finalize)
    # bv_ref: (1, INNER)  f32
    # o_ref : (TQ, INNER)
    # scratch: m_sc/l_sc (TQ, 1) f32, acc_sc (TQ, INNER) f32
    ki = pl.program_id(2)

    @pl.when(ki == 0)
    def _init():
        m_sc[...] = jnp.full(m_sc.shape, -jnp.inf, dtype=m_sc.dtype)
        l_sc[...] = jnp.zeros(l_sc.shape, dtype=l_sc.dtype)
        acc_sc[...] = jnp.zeros(acc_sc.shape, dtype=acc_sc.dtype)

    # s = q @ k^T without materializing a transpose (contract last dims).
    s = jax.lax.dot_general(
        q_ref[...], k_ref[...],
        dimension_numbers=(((1,), (1,)), ((), ())),
        preferred_element_type=jnp.float32)                  # (TQ, TK)

    # Online softmax update (exp/max/sum land on EUP/XLU slots, hide under MXU).
    m_prev = m_sc[...]
    m_new = jnp.maximum(m_prev, jnp.max(s, axis=-1, keepdims=True))
    alpha = jnp.exp(m_prev - m_new)
    p = jnp.exp(s - m_new)                                   # un-normalized
    l_sc[...] = alpha * l_sc[...] + jnp.sum(p, axis=-1, keepdims=True)
    acc_sc[...] = alpha * acc_sc[...] + jnp.dot(
        p.astype(jnp.bfloat16), v_ref[...], preferred_element_type=jnp.float32)
    m_sc[...] = m_new

    @pl.when(ki == pl.num_programs(2) - 1)
    def _finalize():
        # Deferred normalization + deferred bv (attention rows sum to 1, so
        # attn @ (v + bv) == attn @ v + bv exactly).
        inv_l = pl.reciprocal(l_sc[...], approx=True)
        o_ref[...] = (acc_sc[...] * inv_l + bv_ref[...]).astype(o_ref.dtype)


def attention_head(x, wq, bq, wk, bk, wv, bv, *, tq=512, tk=512, ts=512):
    """x: (B, S, D) f32; w*: (D, INNER); b*: (INNER,). Returns (B, S, INNER)."""
    B, S, D = x.shape
    scale = 1.0 / math.sqrt(D)

    tq = min(tq, S)
    tk = min(tk, S)
    ts = min(ts, S)
    # Keep >= 2 q tiles when B == 1 so both v7x TensorCores get grid points.
    if B == 1 and S // tq < 2 and S % 2 == 0 and (S // 2) % 8 == 0:
        tq = S // 2
    # TODO(synk): for S not a multiple of the tile sizes, pad and mask padded
    # kv columns to -inf before the softmax (and drop padded q rows).
    assert S % tq == 0 and S % tk == 0 and S % ts == 0

    # Host-side prep: bf16 x, fold 1/sqrt(D) into the Q projection, drop bk
    # (cancels in softmax), defer bv to the finalize.
    x_bf = x.astype(jnp.bfloat16)
    wqkv = jnp.concatenate([wq * scale, wk, wv], axis=1).astype(jnp.bfloat16)
    bq_s = (bq * scale).reshape(1, INNER_SIZE).astype(jnp.float32)
    bv_r = bv.reshape(1, INNER_SIZE).astype(jnp.float32)

    vmem_params = dict(vmem_limit_bytes=32 * 1024 * 1024)

    # ---- Stage 1: fused QKV projection, once per (batch, seq-tile). ----------
    const2 = lambda b, si: (0, 0)
    q, k, v = pl.pallas_call(
        _qkv_projection_kernel,
        out_shape=(
            jax.ShapeDtypeStruct((B, S, INNER_SIZE), jnp.bfloat16),
            jax.ShapeDtypeStruct((B, S, INNER_SIZE), jnp.bfloat16),
            jax.ShapeDtypeStruct((B, S, INNER_SIZE), jnp.bfloat16),
        ),
        grid_spec=pltpu.PrefetchScalarGridSpec(
            num_scalar_prefetch=0,
            grid=(B, S // ts),
            in_specs=[
                pl.BlockSpec((None, ts, D), lambda b, si: (b, si, 0)),      # x
                pl.BlockSpec((D, 3 * INNER_SIZE), const2),                  # [Wq*s|Wk|Wv]
                pl.BlockSpec((1, INNER_SIZE), const2),                      # bq*s
            ],
            out_specs=[
                pl.BlockSpec((None, ts, INNER_SIZE), lambda b, si: (b, si, 0)),
                pl.BlockSpec((None, ts, INNER_SIZE), lambda b, si: (b, si, 0)),
                pl.BlockSpec((None, ts, INNER_SIZE), lambda b, si: (b, si, 0)),
            ],
        ),
        compiler_params=pltpu.CompilerParams(
            dimension_semantics=("parallel", "parallel"), **vmem_params),
    )(x_bf, wqkv, bq_s)

    # ---- Stage 2: flash-style attention over pre-projected Q/K/V. ------------
    const3 = lambda b, qi, ki: (0, 0)
    return pl.pallas_call(
        _flash_attention_kernel,
        out_shape=jax.ShapeDtypeStruct((B, S, INNER_SIZE), x.dtype),
        grid_spec=pltpu.PrefetchScalarGridSpec(
            num_scalar_prefetch=0,
            grid=(B, S // tq, S // tk),
            in_specs=[
                pl.BlockSpec((None, tq, INNER_SIZE), lambda b, qi, ki: (b, qi, 0)),
                pl.BlockSpec((None, tk, INNER_SIZE), lambda b, qi, ki: (b, ki, 0)),
                pl.BlockSpec((None, tk, INNER_SIZE), lambda b, qi, ki: (b, ki, 0)),
                pl.BlockSpec((1, INNER_SIZE), const3),                      # bv
            ],
            out_specs=pl.BlockSpec((None, tq, INNER_SIZE),
                                   lambda b, qi, ki: (b, qi, 0)),
            scratch_shapes=[
                pltpu.VMEM((tq, 1), jnp.float32),             # running max
                pltpu.VMEM((tq, 1), jnp.float32),             # running sum
                pltpu.VMEM((tq, INNER_SIZE), jnp.float32),    # output accumulator
            ],
        ),
        compiler_params=pltpu.CompilerParams(
            dimension_semantics=("parallel", "parallel", "arbitrary"),
            **vmem_params),
    )(q, k, v, bv_r)


def _reference(x, wq, bq, wk, bk, wv, bv):
    D = x.shape[-1]
    q = x @ wq + bq
    k = x @ wk + bk
    v = x @ wv + bv
    attn = jnp.einsum("bqd,bkd->bqk", q, k) / math.sqrt(D)
    attn = jax.nn.softmax(attn, axis=-1)
    return jnp.einsum("bqk,bkd->bqd", attn, v)


if __name__ == "__main__":
    batch, seq_len, emb_size = 2, 8, 32

    key = jax.random.PRNGKey(0)
    kx, kwq, kbq, kwk, kbk, kwv, kbv = jax.random.split(key, 7)

    # deterministic parameter init (mimics nn.Linear uniform(-1/sqrt(fan_in), ...))
    bound = 1.0 / math.sqrt(emb_size)
    wq = jax.random.uniform(kwq, (emb_size, INNER_SIZE), jnp.float32, -bound, bound)
    bq = jax.random.uniform(kbq, (INNER_SIZE,), jnp.float32, -bound, bound)
    wk = jax.random.uniform(kwk, (emb_size, INNER_SIZE), jnp.float32, -bound, bound)
    bk = jax.random.uniform(kbk, (INNER_SIZE,), jnp.float32, -bound, bound)
    wv = jax.random.uniform(kwv, (emb_size, INNER_SIZE), jnp.float32, -bound, bound)
    bv = jax.random.uniform(kbv, (INNER_SIZE,), jnp.float32, -bound, bound)

    x = jax.random.normal(kx, (batch, seq_len, emb_size), jnp.float32)

    out = attention_head(x, wq, bq, wk, bk, wv, bv)
    out = jax.block_until_ready(out)

    ref = _reference(x, wq, bq, wk, bk, wv, bv)
    assert out.shape == (batch, seq_len, INNER_SIZE)
    # bf16 MXU inputs + approx reciprocal => bf16-level (not 1e-4) agreement.
    assert jnp.allclose(out, ref, atol=5e-2, rtol=5e-2), (
        float(jnp.max(jnp.abs(out - ref))))

    print("KERNEL_OK")
</pallas_src>

<mosaic_0001>
module attributes {stable_mosaic.version = 11 : i64} {
  func.func @_qkv_projection_kernel(%arg0: i32, %arg1: i32, %arg2: memref<1x8x32xbf16, #tpu.memory_space<vmem>>, %arg3: memref<32x768xbf16, #tpu.memory_space<vmem>>, %arg4: memref<1x256xf32, #tpu.memory_space<vmem>>, %arg5: memref<1x8x256xbf16, #tpu.memory_space<vmem>>, %arg6: memref<1x8x256xbf16, #tpu.memory_space<vmem>>, %arg7: memref<1x8x256xbf16, #tpu.memory_space<vmem>>) attributes {dimension_semantics = [#tpu.dimension_semantics<parallel>, #tpu.dimension_semantics<parallel>], iteration_bounds = array<i64: 2, 1>, scalar_prefetch = 0 : i64, scratch_operands = 0 : i64, tpu.core_type = #tpu.core_type<tc>, window_params = [{transform_indices = @transform_0, window_bounds = array<i64: 1, 8, 32>}, {pipeline_mode = #tpu.pipeline_mode<synchronous>, transform_indices = @transform_1, window_bounds = array<i64: 32, 768>}, {pipeline_mode = #tpu.pipeline_mode<synchronous>, transform_indices = @transform_2, window_bounds = array<i64: 1, 256>}, {transform_indices = @transform_3, window_bounds = array<i64: 1, 8, 256>}, {transform_indices = @transform_4, window_bounds = array<i64: 1, 8, 256>}, {transform_indices = @transform_5, window_bounds = array<i64: 1, 8, 256>}]} {
    %c0 = arith.constant 0 : index
    %c0_0 = arith.constant 0 : index
    %c0_1 = arith.constant 0 : index
    %0 = vector.load %arg2[%c0, %c0_0, %c0_1] : memref<1x8x32xbf16, #tpu.memory_space<vmem>>, vector<1x8x32xbf16>
    %1 = vector.shape_cast %0 : vector<1x8x32xbf16> to vector<8x32xbf16>
    %c0_2 = arith.constant 0 : index
    %c0_3 = arith.constant 0 : index
    %2 = vector.load %arg3[%c0_2, %c0_3] : memref<32x768xbf16, #tpu.memory_space<vmem>>, vector<32x768xbf16>
    %cst = arith.constant dense<0.000000e+00> : vector<8x768xf32>
    %3 = tpu.matmul %1, %2, %cst {dimension_numbers = #tpu.dot_dimension_numbers<[1], [0], [0], [1], [0, 0, 1, 1], [], []>} : vector<8x32xbf16>, vector<32x768xbf16>, vector<8x768xf32> -> vector<8x768xf32>
    %4 = vector.extract_strided_slice %3 {offsets = [0, 0], sizes = [8, 256], strides = [1, 1]} : vector<8x768xf32> to vector<8x256xf32>
    %c0_4 = arith.constant 0 : index
    %c0_5 = arith.constant 0 : index
    %5 = vector.load %arg4[%c0_4, %c0_5] : memref<1x256xf32, #tpu.memory_space<vmem>>, vector<1x256xf32>
    %6 = vector.broadcast %5 : vector<1x256xf32> to vector<8x256xf32>
    %7 = arith.addf %4, %6 : vector<8x256xf32>
    %8 = arith.truncf %7 : vector<8x256xf32> to vector<8x256xbf16>
    %c0_6 = arith.constant 0 : index
    %c0_7 = arith.constant 0 : index
    %c0_8 = arith.constant 0 : index
    %9 = vector.load %arg5[%c0_6, %c0_7, %c0_8] : memref<1x8x256xbf16, #tpu.memory_space<vmem>>, vector<1x8x256xbf16>
    %10 = vector.shape_cast %9 : vector<1x8x256xbf16> to vector<8x256xbf16>
    %11 = vector.shape_cast %8 : vector<8x256xbf16> to vector<1x8x256xbf16>
    tpu.vector_store %arg5[%c0_6, %c0_7, %c0_8], %11 {strides = array<i32>} : memref<1x8x256xbf16, #tpu.memory_space<vmem>>, vector<1x8x256xbf16>,
    %12 = vector.extract_strided_slice %3 {offsets = [0, 256], sizes = [8, 256], strides = [1, 1]} : vector<8x768xf32> to vector<8x256xf32>
    %13 = arith.truncf %12 : vector<8x256xf32> to vector<8x256xbf16>
    %c0_9 = arith.constant 0 : index
    %c0_10 = arith.constant 0 : index
    %c0_11 = arith.constant 0 : index
    %14 = vector.load %arg6[%c0_9, %c0_10, %c0_11] : memref<1x8x256xbf16, #tpu.memory_space<vmem>>, vector<1x8x256xbf16>
    %15 = vector.shape_cast %14 : vector<1x8x256xbf16> to vector<8x256xbf16>
    %16 = vector.shape_cast %13 : vector<8x256xbf16> to vector<1x8x256xbf16>
    tpu.vector_store %arg6[%c0_9, %c0_10, %c0_11], %16 {strides = array<i32>} : memref<1x8x256xbf16, #tpu.memory_space<vmem>>, vector<1x8x256xbf16>,
    %17 = vector.extract_strided_slice %3 {offsets = [0, 512], sizes = [8, 256], strides = [1, 1]} : vector<8x768xf32> to vector<8x256xf32>
    %18 = arith.truncf %17 : vector<8x256xf32> to vector<8x256xbf16>
    %c0_12 = arith.constant 0 : index
    %c0_13 = arith.constant 0 : index
    %c0_14 = arith.constant 0 : index
    %19 = vector.load %arg7[%c0_12, %c0_13, %c0_14] : memref<1x8x256xbf16, #tpu.memory_space<vmem>>, vector<1x8x256xbf16>
    %20 = vector.shape_cast %19 : vector<1x8x256xbf16> to vector<8x256xbf16>
    %21 = vector.shape_cast %18 : vector<8x256xbf16> to vector<1x8x256xbf16>
    tpu.vector_store %arg7[%c0_12, %c0_13, %c0_14], %21 {strides = array<i32>} : memref<1x8x256xbf16, #tpu.memory_space<vmem>>, vector<1x8x256xbf16>,
    return
  }
  func.func @transform_0(%arg0: i32, %arg1: i32) -> (i32, i32, i32) {
    %c0_i32 = arith.constant 0 : i32
    %c0_i32_0 = arith.constant 0 : i32
    return %arg0, %arg1, %c0_i32 : i32, i32, i32
  }
  func.func @transform_1(%arg0: i32, %arg1: i32) -> (i32, i32) {
    %c0_i32 = arith.constant 0 : i32
    %c0_i32_0 = arith.constant 0 : i32
    %c0_i32_1 = arith.constant 0 : i32
    return %c0_i32, %c0_i32_0 : i32, i32
  }
  func.func @transform_2(%arg0: i32, %arg1: i32) -> (i32, i32) {
    %c0_i32 = arith.constant 0 : i32
    %c0_i32_0 = arith.constant 0 : i32
    %c0_i32_1 = arith.constant 0 : i32
    return %c0_i32, %c0_i32_0 : i32, i32
  }
  func.func @transform_3(%arg0: i32, %arg1: i32) -> (i32, i32, i32) {
    %c0_i32 = arith.constant 0 : i32
    %c0_i32_0 = arith.constant 0 : i32
    return %arg0, %arg1, %c0_i32 : i32, i32, i32
  }
  func.func @transform_4(%arg0: i32, %arg1: i32) -> (i32, i32, i32) {
    %c0_i32 = arith.constant 0 : i32
    %c0_i32_0 = arith.constant 0 : i32
    return %arg0, %arg1, %c0_i32 : i32, i32, i32
  }
  func.func @transform_5(%arg0: i32, %arg1: i32) -> (i32, i32, i32) {
    %c0_i32 = arith.constant 0 : i32
    %c0_i32_0 = arith.constant 0 : i32
    return %arg0, %arg1, %c0_i32 : i32, i32, i32
  }
}

</mosaic_0001>

<bundles_post_ra>
// kernel: tpu_custom_call.1
= control target key start
LH: loop header
LB: loop body
LE: loop exit
PB: predicated region body
PF: predicated region fallthrough
CT: control target
= control target key end

     0   :  { %s1448_s0 = inlined_call_operand.hbm [shape: bf16[2,8,32], index: 0, kind: input, shape index: {}]   ;;  %s1449_s1 = inlined_call_operand.hbm [shape: bf16[32,768], index: 1, kind: input, shape index: {}]   ;;  %s1450_s2 = inlined_call_operand.vmem [shape: f32[1,256], index: 2, kind: input, shape index: {}]   ;;  %s1451_s3 = inlined_call_operand.hbm [shape: bf16[2,8,256], index: 3, kind: output, shape index: {0}]   ;;  %s1452_s4 = inlined_call_operand.hbm [shape: bf16[2,8,256], index: 4, kind: output, shape index: {1}]   ;;  %s1453_s5 = inlined_call_operand.hbm [shape: bf16[2,8,256], index: 5, kind: output, shape index: {2}]  }
   0x1   :  { %1459 = sst [smem:[#allocation15_spill]] %s1448_s0 }
   0x2   :  { %11 = vsyncpa [#allocation3], 0 }
   0x3   :  { %13 = vsyncpa [#allocation3 + $0x1], 0 }
   0x4   :  { %14 = vsyncpa [#allocation6], 0 }
   0x5   :  { %15 = vsyncpa [#allocation4], 0 }
   0x6   :  { %17 = vsyncpa [#allocation4 + $0x1], 0 }
   0x7   :  { %18 = vsyncpa [#allocation9], 0 }
   0x8   :  { %20 = vsyncpa [#allocation9 + $0x1], 0  ;;  %s1150_s18 = smov 0   ;;  %s1152_s19 = smov 0  }
   0x9   :  { %s1154_s20 = smov 0   ;;  %s1156_s21 = smov 0  }
   0xa   :  { %s1158_s22 = smov 0   ;;  %s1160_s23 = smov 0  }
   0xb LB: > { %s1181_s24 = sadd.s32 4294967295, %s1110_s23   ;;  %s1457_s25 = sadd.s32 4294967294, %s1110_s23   ;;  %s1110_s23 = sphi %s1160_s23, %s26_s23   ;;  %s1106_s22 = sphi %s1158_s22, %s1482_s22   ;;  %s1102_s21 = sphi %s1156_s21, %s1481_s21   ;;  %s1098_s20 = sphi %s1154_s20, %s1480_s20   ;;  %s1094_s19 = sphi %s1152_s19, %s1479_s19   ;;  %s1090_s18 = sphi %s1150_s18, %s1478_s18  }
   0xc   : > { %p60_p0 = scmp.ne.s32.totalorder %s1094_s19, %s1090_s18  ;;  %p1454_p1 = scmp.eq.s32.totalorder %s1181_s24, 0 }
   0xd   : > { %p134_p3 = scmp.eq.s32.totalorder %s1457_s25, 1  ;;  %p756_p5 = scmp.ge.s32.totalorder %s1110_s23, 1 }
   0xe   : > { %p1192_p4 = por %p1454_p1, %p60_p0  ;;  %p197_p7 = scmp.lt.s32.totalorder %s1110_s23, 3 }
   0xf   : > { %p1197_p6 = por %p134_p3, %p60_p0  ;;  %s1112_s29 = smov [#allocation5]  }
  0x10   : > { %s1460_s26 = scalar_select %p1192_p4, 1, 0 }
  0x11   : > { %s1461_s27 = scalar_select %p1197_p6, 1, 0 }
  0x12   : > { %p1202_p8 = pnand %p756_p5, %p197_p7  ;;  %s209_s30 = sshll.u32 %s1112_s29, 4  ;;  %s210_s30 = int_to_ptr.vmem [resolvable:$true] %s209_s30 }
  0x13   : > { %s38_s7 = sadd.s32 1, %s1106_s22  ;;  %s906_s10 = scalar_lea.hbm %s1449_s1, 1536 }
  0x14   : > { %s1462_s28 = scalar_select %p1202_p8, 1, 0 }
  0x15   : > { %p814_p9 = pneg %p1202_p8  ;;  %p907_p12 = scmp.ne.s32.totalorder %s1449_s1, %s906_s10 }
  0x16   : > { %p913_p5 = scmp.lt.u32.totalorder %s906_s10, %s1449_s1 }
  0x17   : > { %p1211_p11 = pnand %p814_p9, %p1454_p1 }
  0x19   : > { %p908_p13 = pneg %p1211_p11 }
  0x1b   : > { %p909_p0 = pnand %p908_p13, %p907_p12 }
  0x1d   : > { %p910_p3 = pneg %p909_p0 }
  0x1f   : > { %p915_p7 = pnand %p913_p5, %p910_p3 }
  0x21   : > { %918 = shalt.err (!%p915_p7)
}
  0x22   : > { %s919_s15 = scalar_lea.vmem %s210_s30, 1536  ;;  %p927_p2 = scmp.lt.s32.totalorder %s210_s30, %s210_s30 }
  0x23   : > { %p920_p9 = scmp.ne.s32.totalorder %s210_s30, %s919_s15  ;;  %p928_p6 = scmp.lt.s32.totalorder %s919_s15, %s919_s15 }
  0x25   : > { %p922_p10 = pnand %p920_p9, %p908_p13  ;;  %p929_p4 = por %p928_p6, %p927_p2 }
  0x27   : > { %p923_p1 = pneg %p922_p10 }
  0x29   : > { %p930_p8 = pnand %p929_p4, %p923_p1 }
  0x2b   : > { %933 = shalt.err (!%p930_p8)
}
  0x2c   : > { %s1113_s16 = smov 384   ;;  %s1114_s17 = smov 24  }
  0x2d   : > { %817 = dma.hbm_to_vmem [thread:$0]  (!%p1211_p11), %s1449_s1, 1536, %s210_s30, [#allocation6], %s1113_s16, %s1113_s16, %s1114_s17  }
  0x2e   : > { %p40_p1 = scmp.ge.s32.totalorder %s38_s7, 2  ;;  %s47_s9 = sadd.s32 1, %s1098_s20 }
  0x2f   : > { %p54_p2 = scmp.ne.s32.totalorder %s1098_s20, %s1094_s19  ;;  %p55_p4 = scmp.eq.s32.totalorder %s1110_s23, 0 }
  0x30   : > { %s1484_s7 = smov (%p40_p1, %s38_s7), 0  ;;  %p1465_p8 = scmp.eq.s32.totalorder %s1181_s24, 1 }
  0x31   : > { %p1238_p6 = por %p55_p4, %p54_p2  ;;  %s42_s6 = ssub.s32 %s1106_s22, %s1484_s7 }
  0x32   : > { %p1244_p10 = por %p1465_p8, %p54_p2  ;;  %p833_p12 = scmp.lt.s32.totalorder %s1110_s23, 2 }
  0x33   : > { %p45_p11 = scmp.eq.s32.totalorder %s42_s6, 0  ;;  %s226_s30 = sand.u32 1, %s1098_s20  }
  0x34   : > { %s759_s12 = sshll.u32 %s226_s30, 2  ;;  %s760_s14 = sshll.u32 %s1106_s22, 6 }
  0x35   : > { %s1253_s13 = scalar_select %p45_p11, %s1098_s20, %s47_s9  }
  0x36   : > { %s1467_s0 = sld [smem:[#allocation15_spill]]  ;;  %s230_s29 = scalar_lea.vmem [#allocation2], %s759_s12 }
  0x37   : > { %s238_s8 = sshll.u32 %s230_s29, 4  ;;  %p1265_p13 = pnand %p833_p12, %p1238_p6  ;;  %s1261_s8 = int_to_ptr.vmem [resolvable:$true] %s238_s8 }
  0x38   : > { %s227_s9 = scalar_lea.sflag [#allocation3], %s226_s30 }
  0x39   : > { %p936_p3 = pneg %p1265_p13 }
  0x3c   : > { %s1259_s17 = scalar_lea.hbm %s1467_s0, %s760_s14  ;;  %s939_s15 = scalar_lea.hbm %s1467_s0, 128 }
  0x3d   : > { %s934_s25 = scalar_lea.hbm %s1259_s17, 64  ;;  %p940_p9 = scmp.lt.u32.totalorder %s1259_s17, %s1467_s0 }
  0x3e   : > { %p935_p0 = scmp.ne.s32.totalorder %s1259_s17, %s934_s25  ;;  %p941_p1 = scmp.lt.u32.totalorder %s939_s15, %s934_s25 }
  0x3f   : > { %p943_p4 = scmp.lt.u32.totalorder %s934_s25, %s1259_s17 }
  0x40   : > { %p937_p5 = pnand %p936_p3, %p935_p0  ;;  %p942_p2 = por %p941_p1, %p940_p9 }
  0x42   : > { %p938_p7 = pneg %p937_p5  ;;  %p944_p6 = por %p943_p4, %p942_p2 }
  0x44   : > { %p945_p8 = pnand %p944_p6, %p938_p7 }
  0x46   : > { %948 = shalt.err (!%p945_p8)
}
  0x47   : > { %s949_s30 = scalar_lea.vmem %s1261_s8, 64  ;;  %s1115_s29 = smov [#allocation2]  }
  0x48   : > { %p950_p12 = scmp.ne.s32.totalorder %s1261_s8, %s949_s30  ;;  %s954_s12 = sshll.u32 %s1115_s29, 4  ;;  %s955_s12 = int_to_ptr.vmem [resolvable:$false] %s954_s12 }
  0x49   : > { %s956_s14 = scalar_lea.vmem %s955_s12, 128  ;;  %p957_p5 = scmp.lt.s32.totalorder %s1261_s8, %s955_s12 }
  0x4a   : > { %p952_p11 = pnand %p950_p12, %p936_p3  ;;  %p958_p9 = scmp.lt.s32.totalorder %s956_s14, %s949_s30 }
  0x4c   : > { %p953_p0 = pneg %p952_p11  ;;  %p959_p1 = por %p958_p9, %p957_p5 }
  0x4e   : > { %p960_p2 = pnand %p959_p1, %p953_p0 }
  0x50   : > { %963 = shalt.err (!%p960_p2)
}
  0x51   : > { %821 = dma.hbm_to_vmem [thread:$0]  (!%p1265_p13), %s1259_s17, 64, %s1261_s8, %s227_s9  }
  0x52   : > { %p1469_p7 = scmp.ne.s32.totalorder %s1462_s28, 0 }
  0x53   : > { %s1297_s25 = sand.u32 (!%p1469_p7), 1, %s1094_s19   ;;  %p1470_p3 = scmp.ne.s32.totalorder (!%p1469_p7), %s1460_s26, 0 }
  0x54   : > { %247 = sbr.rel (%p1469_p7) target bundleno = 383 (0x17f), region = 32  ;;  %s762_s15 = sshll.u32 (!%p1469_p7), %s1297_s25, 2 }
  0x55   : > { %s250_s10 = scalar_lea.sflag (!%p1469_p7), [#allocation3], %s1297_s25  ;;  %s253_s16 = scalar_lea.vmem (!%p1469_p7), [#allocation2], %s762_s15 }
  0x5b   : > { %1073 = dma.done.wait (%p1470_p3), %s250_s10, 64  }
  0x5c   : > { %1075 = vsyncadd (%p1470_p3), %s250_s10, 4294967232  ;;  %p1471_p4 = scmp.eq.s32.totalorder %s1181_s24, 0 }
  0x5e   : > { %1077 = dma.done.wait (%p1471_p4), [#allocation6], 1536   ;;  %p1472_p13 = pmov %p1471_p4 }
  0x5f   : > { %v1116_v0 = vmov 0   ;;  %v888_v1 = vld [vmem:[#allocation5 + $0x4] ss:$24 sps:$4 sm:$0xff]   ;;  %v890_v2 = vld [vmem:[#allocation5] ss:$24 sps:$4 sm:$0xff]   ;;  %vm368_vm0 = vcmask 261120   ;;  %v497_v14 = vlaneseq }
  0x60   : > { %1079 = vsyncadd (%p1472_p13), [#allocation6], 4294965760  ;;  %404 = vmatprep.mubr.bf16.mxu0 %v1116_v0  ;;  %445 = vmatprep.mubr.bf16.mxu1 %v1116_v0  ;;  %v891_v3 = vld [vmem:[#allocation5 + $0x34] ss:$24 sps:$4 sm:$0xff]   ;;  %v893_v4 = vld [vmem:[#allocation5 + $0x30] ss:$24 sps:$4 sm:$0xff]  }
  0x61   : > { %372 = vmatprep.subr.bf16.mxu0 %v888_v1  ;;  %v894_v5 = vld [vmem:[#allocation5 + $0xc] ss:$24 sps:$4 sm:$0xff]   ;;  %v896_v6 = vld [vmem:[#allocation5 + $0x8] ss:$24 sps:$4 sm:$0xff]   ;;  %v295_v7 = vld [vmem:[%s253_s16] sm:$0xf] }
  0x62   : > { %373 = vmatpush1.bf16.msra.mxu0 %v890_v2  ;;  %413 = vmatprep.subr.bf16.mxu1 %v894_v5  ;;  %v899_v8 = vld [vmem:[#allocation5 + $0x14] ss:$24 sps:$4 sm:$0xff]   ;;  %v902_v10 = vld [vmem:[#allocation5 + $0x38] ss:$24 sps:$4 sm:$0xff]   ;;  %v905_v12 = vld [vmem:[#allocation5 + $0x44] ss:$24 sps:$4 sm:$0xff]  }
  0x63   : > { %374 = vmatprep.subr.bf16.mxu0 %v891_v3  ;;  %414 = vmatpush1.bf16.msra.mxu1 %v896_v6  ;;  %v900_v9 = vld [vmem:[#allocation5 + $0x3c] ss:$24 sps:$4 sm:$0xff]   ;;  %v897_v11 = vld [vmem:[#allocation5 + $0x10] ss:$24 sps:$4 sm:$0xff]   ;;  %v903_v13 = vld [vmem:[#allocation5 + $0x40] ss:$24 sps:$4 sm:$0xff]  }
  0x64   : > { %415 = vmatprep.subr.bf16.mxu1 %v900_v9  ;;  %v498_v15 = vshrl.u32 %v497_v14, 7  ;;  %v495_v17 = vld [vmem:[%s1450_s2] sm:$0x3]  ;;  %s1313_s17 = sshll.u32 %s1297_s25, 3  ;;  %s1317_s6 = sshll.u32 %s1102_s21, 7 }
  0x65   : > { %s279_s9 = scalar_lea.vmem [#allocation7], %s1313_s17  ;;  %s286_s29 = scalar_lea.vmem [#allocation8], %s1313_s17 }
  0x66   : > { %375 = vmatpush1.bf16.msra.mxu0 %v893_v4  ;;  %v499_v16 = vsub.s32 0, %v498_v15  ;;  %v503_v18 = vsub.s32 1, %v498_v15  ;;  %s563_s30 = sshll.u32 %s279_s9, 4  ;;  %s579_s12 = sshll.u32 %s286_s29, 4  ;;  %s1327_s30 = int_to_ptr.vmem [resolvable:$true] %s563_s30  ;;  %s1335_s12 = int_to_ptr.vmem [resolvable:$true] %s579_s12 }
  0x67   : > { %454 = vmatprep.subr.bf16.mxu0 %v899_v8  ;;  %416 = vmatpush1.bf16.msra.mxu1 %v902_v10  ;;  %s1325_s21 = scalar_lea.hbm %s1451_s3, %s1317_s6  ;;  %s1333_s26 = scalar_lea.hbm %s1452_s4, %s1317_s6 }
  0x68   : > { %v500_v19 = vrot.slane %v495_v17, %v499_v16  ;;  %v504_v20 = vrot.slane %v495_v17, %v503_v18  ;;  %s1458_s28 = scalar_lea.vmem [#allocation10], %s1313_s17  ;;  %s537_s15 = scalar_lea.sflag [#allocation4], %s1297_s25 }
  0x69   : > { %779 = vmatmul.mubr.msk.bf16.vlgmr.msra.gmra.mrb[0].mxu0 %vm368_vm0, %v295_v7  ;;  %s1340_s14 = sshll.u32 %s1458_s28, 4  ;;  %s964_s8 = scalar_lea.vmem %s1327_s30, 128  ;;  %s1397_s14 = int_to_ptr.vmem [resolvable:$true] %s1340_s14 }
  0x6a   : > { %455 = vmatpush1.bf16.msra.mxu0 %v897_v11  ;;  %486 = vmatprep.mubr.bf16.mxu0 %v1116_v0  ;;  %p965_p6 = scmp.ne.s32.totalorder %s1327_s30, %s964_s8  ;;  %s1117_s0 = smov [#allocation7]  }
  0x6b   : > { %456 = vmatprep.subr.bf16.mxu0 %v905_v12  ;;  %780 = vmatmul.mubr.msk.bf16.vlgmr.msra.gmra.mrb[0].mxu1 %vm368_vm0, %v295_v7  ;;  %s968_s10 = sshll.u32 %s1117_s0, 4  ;;  %s969_s10 = int_to_ptr.vmem [resolvable:$false] %s968_s10 }
  0x6c   : > { %p966_p8 = pnand %p965_p6, %p1244_p10  ;;  %s970_s16 = scalar_lea.vmem %s969_s10, 256 }
  0x6d   : > { %p971_p11 = scmp.lt.s32.totalorder %s1327_s30, %s969_s10  ;;  %p972_p0 = scmp.lt.s32.totalorder %s970_s16, %s964_s8 }
  0x6e   : > { %457 = vmatpush1.bf16.msra.mxu0 %v903_v13  ;;  %p967_p12 = pneg %p966_p8 }
  0x6f   : > { %p973_p5 = por %p972_p0, %p971_p11 }
  0x71   : > { %781 = vmatmul.mubr.msk.bf16.vlgmr.msra.gmra.mrb[4].mxu0 %vm368_vm0, %v295_v7  ;;  %p974_p9 = pnand %p973_p5, %p967_p12 }
 0x13c   : > { %v406_v21 = vpop.f32.mrb[0].mxu0 }
 0x13d   : > { %v507_v22 = vadd.f32 %v500_v19, %v406_v21  ;;  %v408_v23 = vpop.f32.mrb[1].mxu0 }
 0x13e   : > { %v508_v24 = vadd.f32 %v504_v20, %v408_v23  ;;  %v410_v25 = vpop.f32.mrb[2].mxu0  ;;  %v447_v27 = vpop.f32.mrb[0].mxu1 }
 0x13f   : > { %v411_v26 = vpop.f32.mrb[3].mxu0  ;;  %v449_v29 = vpop.f32.mrb[1].mxu1 }
 0x140   : > { %v796_v28 = vpack.c.bf16 %v508_v24, %v507_v22  ;;  %v797_v30 = vpack.c.bf16 %v449_v29, %v447_v27  ;;  %v451_v31 = vpop.f32.mrb[2].mxu1 }
 0x141   : > { %v452_v32 = vpop.f32.mrb[3].mxu1 }
 0x142   : > { %517 = vst [vmem:[%s279_s9] sm:$0xff] %v796_v28  ;;  %526 = vst [vmem:[%s286_s29] sm:$0xff] %v797_v30 }
 0x143   : > { %977 = shalt.err (!%p974_p9)
}
 0x144   : > { %s978_s25 = scalar_lea.hbm %s1325_s21, 128  ;;  %s982_s0 = scalar_lea.hbm %s1451_s3, 256 }
 0x145   : > { %p979_p1 = scmp.ne.s32.totalorder %s1325_s21, %s978_s25  ;;  %p983_p3 = scmp.lt.u32.totalorder %s1325_s21, %s1451_s3 }
 0x146   : > { %p984_p4 = scmp.lt.u32.totalorder %s982_s0, %s978_s25  ;;  %p986_p6 = scmp.lt.u32.totalorder %s978_s25, %s1325_s21 }
 0x147   : > { %p980_p2 = pnand %p979_p1, %p1244_p10 }
 0x148   : > { %p985_p13 = por %p984_p4, %p983_p3 }
 0x149   : > { %p981_p7 = pneg %p980_p2 }
 0x14a   : > { %p987_p8 = por %p986_p6, %p985_p13 }
 0x14c   : > { %p988_p12 = pnand %p987_p8, %p981_p7 }
 0x14e   : > { %991 = shalt.err (!%p988_p12)
}
 0x14f   : > { %808 = dma.vmem_to_hbm [thread:$0]  (%p1244_p10), %s1327_s30, 128, %s1325_s21, %s537_s15   ;;  %v488_v33 = vpop.f32.mrb[4].mxu0 }
 0x150   : > { %s1473_s8 = sand.u32 1, %s1181_s24   ;;  %s992_s16 = scalar_lea.vmem %s1335_s12, 128 }
 0x151   : > { %s1366_s28 = scalar_lea.sflag [#allocation9], %s1473_s8  ;;  %p993_p11 = scmp.ne.s32.totalorder %s1335_s12, %s992_s16 }
 0x152   : > { %s1118_s25 = smov [#allocation8]  }
 0x153   : > { %p994_p0 = pnand %p993_p11, %p1244_p10  ;;  %s996_s9 = sshll.u32 %s1118_s25, 4  ;;  %s997_s9 = int_to_ptr.vmem [resolvable:$false] %s996_s9 }
 0x154   : > { %s998_s29 = scalar_lea.vmem %s997_s9, 256  ;;  %p999_p9 = scmp.lt.s32.totalorder %s1335_s12, %s997_s9 }
 0x155   : > { %p995_p5 = pneg %p994_p0  ;;  %p1000_p1 = scmp.lt.s32.totalorder %s998_s29, %s992_s16 }
 0x157   : > { %p1001_p2 = por %p1000_p1, %p999_p9 }
 0x159   : > { %p1002_p7 = pnand %p1001_p2, %p995_p5 }
 0x15b   : > { %1005 = shalt.err (!%p1002_p7)
}
 0x15c   : > { %s1006_s24 = scalar_lea.hbm %s1333_s26, 128  ;;  %s1010_s15 = scalar_lea.hbm %s1452_s4, 256 }
 0x15d   : > { %p1007_p3 = scmp.ne.s32.totalorder %s1333_s26, %s1006_s24  ;;  %p1011_p6 = scmp.lt.u32.totalorder %s1333_s26, %s1452_s4 }
 0x15e   : > { %p1012_p8 = scmp.lt.u32.totalorder %s1010_s15, %s1006_s24  ;;  %p1014_p11 = scmp.lt.u32.totalorder %s1006_s24, %s1333_s26 }
 0x15f   : > { %p1008_p4 = pnand %p1007_p3, %p1244_p10 }
 0x160   : > { %p1013_p12 = por %p1012_p8, %p1011_p6 }
 0x161   : > { %p1009_p13 = pneg %p1008_p4 }
 0x162   : > { %p1015_p0 = por %p1014_p11, %p1013_p12 }
 0x164   : > { %p1016_p5 = pnand %p1015_p0, %p1009_p13 }
 0x166   : > { %1019 = shalt.err (!%p1016_p5)
}
 0x167   : > { %809 = dma.vmem_to_hbm [thread:$0]  (%p1244_p10), %s1335_s12, 128, %s1333_s26, %s1366_s28   ;;  %v490_v34 = vpop.f32.mrb[5].mxu0 }
 0x168   : > { %v798_v35 = vpack.c.bf16 %v490_v34, %v488_v33  ;;  %v492_v36 = vpop.f32.mrb[6].mxu0  ;;  %s1394_s25 = scalar_lea.hbm %s1453_s5, %s1317_s6  ;;  %s1474_s9 = scalar_lea.vmem [#allocation10], %s1313_s17 }
 0x169   : > { %v493_v37 = vpop.f32.mrb[7].mxu0  ;;  %s1020_s29 = scalar_lea.vmem %s1397_s14, 128  ;;  %s1119_s12 = smov [#allocation10]  }
 0x16a   : > { %535 = vst [vmem:[%s1474_s9] sm:$0xff] %v798_v35  ;;  %p1021_p9 = scmp.ne.s32.totalorder %s1397_s14, %s1020_s29  ;;  %s1024_s26 = sshll.u32 %s1119_s12, 4  ;;  %s1025_s26 = int_to_ptr.vmem [resolvable:$false] %s1024_s26 }
 0x16b   : > { %s1026_s24 = scalar_lea.vmem %s1025_s26, 256  ;;  %p1027_p7 = scmp.lt.s32.totalorder %s1397_s14, %s1025_s26 }
 0x16c   : > { %p1022_p1 = pnand %p1021_p9, %p1244_p10  ;;  %p1028_p3 = scmp.lt.s32.totalorder %s1026_s24, %s1020_s29 }
 0x16e   : > { %p1023_p2 = pneg %p1022_p1  ;;  %p1029_p4 = por %p1028_p3, %p1027_p7 }
 0x170   : > { %p1030_p13 = pnand %p1029_p4, %p1023_p2 }
 0x172   : > { %1033 = shalt.err (!%p1030_p13)
}
 0x173   : > { %s1034_s17 = scalar_lea.hbm %s1394_s25, 128  ;;  %s1038_s21 = scalar_lea.hbm %s1453_s5, 256 }
 0x174   : > { %p1035_p6 = scmp.ne.s32.totalorder %s1394_s25, %s1034_s17  ;;  %p1039_p11 = scmp.lt.u32.totalorder %s1394_s25, %s1453_s5 }
 0x175   : > { %p1040_p0 = scmp.lt.u32.totalorder %s1038_s21, %s1034_s17  ;;  %p1042_p9 = scmp.lt.u32.totalorder %s1034_s17, %s1394_s25 }
 0x176   : > { %p1036_p8 = pnand %p1035_p6, %p1244_p10 }
 0x177   : > { %p1041_p5 = por %p1040_p0, %p1039_p11 }
 0x178   : > { %p1037_p12 = pneg %p1036_p8 }
 0x179   : > { %p1043_p1 = por %p1042_p9, %p1041_p5 }
 0x17b   : > { %p1044_p2 = pnand %p1043_p1, %p1037_p12 }
 0x17d   : > { %1047 = shalt.err (!%p1044_p2)
}
 0x17e   : > { %810 = dma.vmem_to_hbm [thread:$0]  (%p1244_p10), %s1397_s14, 128, %s1394_s25, %s1366_s28  }
 0x17f PF: > { %s607_s10 = sand.u32 1, %s1090_s18   ;;  %p1475_p7 = scmp.ne.s32.totalorder %s1461_s27, 0 }
 0x180   : > { %p1476_p3 = scmp.ge.s32.totalorder %s1110_s23, 2  ;;  %s608_s8 = scalar_lea.sflag [#allocation4], %s607_s10 }
 0x182   : > { %p823_p4 = pnand %p1476_p3, %p1475_p7 }
 0x184   : > { %1081 = dma.done.wait (!%p823_p4), %s608_s8, 128  }
 0x185   : > { %1083 = vsyncadd (!%p823_p4), %s608_s8, 4294967168  ;;  %s1477_s16 = sadd.s32 4294967294, %s1110_s23  }
 0x186   : > { %s616_s9 = sand.u32 1, %s1477_s16  }
 0x187   : > { %s617_s29 = scalar_lea.sflag [#allocation9], %s616_s9 }
 0x188   : > { %1085 = dma.done.wait (!%p823_p4), %s617_s29, 256  }
 0x189   : > { %1087 = vsyncadd (!%p823_p4), %s617_s29, 4294967040  ;;  %s26_s23 = sadd.s32 1, %s1110_s23   ;;  %s1478_s18 = smov %s1094_s19 }
 0x18a   : > { %p23_p10 = scmp.ge.s32.totalorder %s26_s23, 4   ;;  %s1479_s19 = smov %s1098_s20 }
 0x18b   : > { %s1480_s20 = smov %s1253_s13  ;;  %s1481_s21 = smov %s1106_s22 }
 0x18c   : > { %s1482_s22 = smov %s1484_s7  ;;  %25 = sbr.rel (!%p23_p10) target bundleno = 11 (0xb), region = 113 }
 0x193   :  { %631 = vsyncpa [#allocation3], 1 }
 0x194   :  { %633 = vsyncpa [#allocation3 + $0x1], 1 }
 0x195   :  { %634 = vsyncpa [#allocation6], 1 }
 0x196   :  { %635 = vsyncpa [#allocation4], 1 }
 0x197   :  { %637 = vsyncpa [#allocation4 + $0x1], 1 }
 0x198   :  { %638 = vsyncpa [#allocation9], 1 }
 0x199   :  { %640 = vsyncpa [#allocation9 + $0x1], 1 }

</bundles_post_ra>
